<compile_context>
chip_gen: v7x
topology: tpu7x:2x2x1
jax: 0.10.0
libtpu: 0.0.40
codegen_flags: <defaults>
</compile_context>

<pallas_src>
import functools
import math

import jax
import jax.numpy as jnp
import numpy as np
from jax.experimental import pallas as pl
from jax.experimental.pallas import tpu as pltpu


def _gsc_partial_kernel(ci_ref, cj_ref,
                        gii_ref, gij_ref, gjj_ref, csi_ref, csj_ref,
                        *, batch, tb, nb_per_core, may_be_ragged):
    """Accumulate per-core-split partial grams / column sums over batch tiles.

    ci_ref/cj_ref: (tb, C) batch tiles (native dtype).
    gii/gij/gjj:   (C, C) f32 accumulators (one output block per core split).
    csi/csj:       (1, C) f32 column-sum accumulators.
    """
    f32 = jnp.float32
    p = pl.program_id(0)          # core-split index ("parallel")
    b = pl.program_id(1)          # batch-tile index ("arbitrary")

    @pl.when(b == 0)
    def _init():
        gii_ref[...] = jnp.zeros_like(gii_ref)
        gij_ref[...] = jnp.zeros_like(gij_ref)
        gjj_ref[...] = jnp.zeros_like(gjj_ref)
        csi_ref[...] = jnp.zeros_like(csi_ref)
        csj_ref[...] = jnp.zeros_like(csj_ref)

    ci = ci_ref[...]
    cj = cj_ref[...]

    if may_be_ragged:
        # Logical (un-clamped) start row of this tile.  Rows >= batch hold
        # unspecified data (partial last block) or duplicated data (clamped
        # fully-out-of-range step) and must be zeroed before EVERY accumulation.
        row_start = (p * nb_per_core + b) * tb
        valid = batch - row_start
        rows = jax.lax.broadcasted_iota(jnp.int32, (tb, 1), 0)
        keep = rows < valid
        ci = jnp.where(keep, ci, jnp.zeros_like(ci))
        cj = jnp.where(keep, cj, jnp.zeros_like(cj))
        ones = keep.astype(ci.dtype)          # doubles as the column-sum vector
    else:
        ones = jnp.ones((tb, 1), dtype=ci.dtype)

    # MXU contracts the batch axis (dim 0 of both operands) with f32 accumulation.
    dn = (((0,), (0,)), ((), ()))
    gii_ref[...] += jax.lax.dot_general(ci, ci, dn, preferred_element_type=f32)
    gij_ref[...] += jax.lax.dot_general(ci, cj, dn, preferred_element_type=f32)
    gjj_ref[...] += jax.lax.dot_general(cj, cj, dn, preferred_element_type=f32)
    # Column sums on the MXU too (ones^T @ c) -> no astype / cross-sublane reduce.
    csi_ref[...] += jax.lax.dot_general(ones, ci, dn, preferred_element_type=f32)
    csj_ref[...] += jax.lax.dot_general(ones, cj, dn, preferred_element_type=f32)


def global_structure_clustering_loss(c_i, c_j, class_num, temperature, *,
                                     block_batch=None):
    """Pallas implementation of Global_structure_clustering.forward."""
    B, C = c_i.shape
    assert c_j.shape == (B, C) and C == class_num
    dtype = c_i.dtype
    itemsize = jnp.dtype(dtype).itemsize
    # dtype-aware sublane multiple: 8 rows (f32), 16 (bf16), 32 (int8/fp8).
    sublane = max(8, 32 // itemsize)

    # ---- batch tile: ~2 MiB per input tile (v7x-safe with 3-deep buffering) ----
    target_bytes = 2 * 1024 * 1024
    if block_batch is None:
        tb = max(1, target_bytes // max(1, C * itemsize))
    else:
        tb = int(block_batch)
    if tb < B:
        tb = max(sublane, (tb // sublane) * sublane)
    if tb >= B:
        tb = B                      # single exact block -> no masking needed

    total_blocks = pl.cdiv(B, tb)
    n_split = 2 if total_blocks >= 2 else 1   # feeds both TensorCores on v7x
    nb_per_core = pl.cdiv(total_blocks, n_split)
    padded_blocks = n_split * nb_per_core
    may_be_ragged = (B % tb != 0) or (padded_blocks != total_blocks)
    last_block = total_blocks - 1

    def in_map(p, b):
        # Clamp so fully-out-of-range steps re-read the last valid block; the
        # kernel masks their contribution to exactly zero.
        return (jnp.minimum(p * nb_per_core + b, last_block), 0)

    kernel = functools.partial(_gsc_partial_kernel,
                               batch=int(B), tb=int(tb),
                               nb_per_core=int(nb_per_core),
                               may_be_ragged=bool(may_be_ragged))

    n_buf = 3 if nb_per_core >= 3 else 2
    in_tile_bytes = tb * C * itemsize
    footprint = 2 * n_buf * in_tile_bytes + 2 * (3 * C * C + 2 * C) * 4 + (1 << 20)
    vmem_limit = int(min(60 * 1024 * 1024,
                         max(32 * 1024 * 1024, footprint + 8 * 1024 * 1024)))

    f32 = jnp.float32

    def acc_spec(nrows):
        return pl.BlockSpec((None, nrows, C), lambda p, b: (p, 0, 0))

    gii_p, gij_p, gjj_p, csi_p, csj_p = pl.pallas_call(
        kernel,
        out_shape=(
            jax.ShapeDtypeStruct((n_split, C, C), f32),   # ci^T ci  (partials)
            jax.ShapeDtypeStruct((n_split, C, C), f32),   # ci^T cj
            jax.ShapeDtypeStruct((n_split, C, C), f32),   # cj^T cj
            jax.ShapeDtypeStruct((n_split, 1, C), f32),   # column sums of c_i
            jax.ShapeDtypeStruct((n_split, 1, C), f32),   # column sums of c_j
        ),
        grid_spec=pltpu.PrefetchScalarGridSpec(
            num_scalar_prefetch=0,
            grid=(n_split, nb_per_core),
            in_specs=[pl.BlockSpec((tb, C), in_map, pipeline_mode=pl.Buffered(n_buf)),
                      pl.BlockSpec((tb, C), in_map, pipeline_mode=pl.Buffered(n_buf))],
            out_specs=(acc_spec(C), acc_spec(C), acc_spec(C),
                       acc_spec(1), acc_spec(1)),
        ),
        compiler_params=pltpu.CompilerParams(
            dimension_semantics=("parallel", "arbitrary"),
            vmem_limit_bytes=vmem_limit),
    )(c_i, c_j)

    # ---- O(C^2) finalize in plain JAX (256 elements for C=16) ----
    gii = jnp.sum(gii_p, axis=0)
    gij = jnp.sum(gij_p, axis=0)
    gjj = jnp.sum(gjj_p, axis=0)
    csi = jnp.sum(csi_p, axis=0).reshape(-1)
    csj = jnp.sum(csj_p, axis=0).reshape(-1)

    # entropy regularizer
    p_i = csi / jnp.sum(csi)
    ne_i = math.log(C) + jnp.sum(p_i * jnp.log(p_i))
    p_j = csj / jnp.sum(csj)
    ne_j = math.log(C) + jnp.sum(p_j * jnp.log(p_j))
    ne_loss = ne_i + ne_j

    # cosine-similarity blocks (eps on the product of norms, like torch's
    # CosineSimilarity), scaled by 1/temperature
    n_i = jnp.sqrt(jnp.diagonal(gii))
    n_j = jnp.sqrt(jnp.diagonal(gjj))
    eps = 1e-8
    s_ii = gii / jnp.maximum(jnp.outer(n_i, n_i), eps) / temperature
    s_ij = gij / jnp.maximum(jnp.outer(n_i, n_j), eps) / temperature
    s_jj = gjj / jnp.maximum(jnp.outer(n_j, n_j), eps) / temperature

    N = 2 * C
    sim = jnp.concatenate(
        [jnp.concatenate([s_ii, s_ij], axis=1),
         jnp.concatenate([s_ij.T, s_jj], axis=1)], axis=0)
    pos = jnp.concatenate([jnp.diagonal(s_ij), jnp.diagonal(s_ij)])   # (N,)

    sim_masked = jnp.where(jnp.eye(N, dtype=bool), -jnp.inf, sim)
    lse = jax.scipy.special.logsumexp(sim_masked, axis=1)
    loss = jnp.sum(lse - pos) / N
    return loss + ne_loss


def _reference_loss(c_i, c_j, class_num, temperature):
    """Pure-JAX reference mirroring the PyTorch module."""
    C = class_num
    N = 2 * C
    p_i = jnp.sum(c_i, axis=0)
    p_i = p_i / jnp.sum(p_i)
    ne_i = math.log(C) + jnp.sum(p_i * jnp.log(p_i))
    p_j = jnp.sum(c_j, axis=0)
    p_j = p_j / jnp.sum(p_j)
    ne_j = math.log(C) + jnp.sum(p_j * jnp.log(p_j))
    ne_loss = ne_i + ne_j

    c = jnp.concatenate([c_i.T, c_j.T], axis=0)                    # (N, B)
    nrm = jnp.linalg.norm(c, axis=1)
    sim = (c @ c.T) / jnp.maximum(nrm[:, None] * nrm[None, :], 1e-8) / temperature
    sim_i_j = jnp.diagonal(sim, offset=C)
    sim_j_i = jnp.diagonal(sim, offset=-C)
    pos = jnp.concatenate([sim_i_j, sim_j_i])                      # (N,)

    eye = jnp.eye(N, dtype=bool)
    sim_masked = jnp.where(eye, -jnp.inf, sim)
    lse = jax.scipy.special.logsumexp(sim_masked, axis=1)
    loss = jnp.sum(lse - pos) / N
    return loss + ne_loss


if __name__ == "__main__":
    class_num = 16
    temperature = 0.5

    key = jax.random.PRNGKey(0)
    ks = jax.random.split(key, 6)

    def mk(k, b):
        return jax.nn.softmax(jax.random.normal(k, (b, class_num), jnp.float32), axis=1)

    # Case 1: single block (batch = 8), default tile heuristic.
    c_i = mk(ks[0], 8)
    c_j = mk(ks[1], 8)
    loss = jax.block_until_ready(
        global_structure_clustering_loss(c_i, c_j, class_num, temperature))
    ref = jax.block_until_ready(_reference_loss(c_i, c_j, class_num, temperature))
    np.testing.assert_allclose(np.asarray(loss), np.asarray(ref), rtol=1e-3, atol=1e-3)

    # Case 2: batch = 28, tile = 8 -> 4 blocks on a (2, 2) grid with a ragged
    # last tile, exercising the in-kernel row mask and the parallel core split.
    c_i2 = mk(ks[2], 28)
    c_j2 = mk(ks[3], 28)
    loss2 = jax.block_until_ready(
        global_structure_clustering_loss(c_i2, c_j2, class_num, temperature,
                                         block_batch=8))
    ref2 = jax.block_until_ready(_reference_loss(c_i2, c_j2, class_num, temperature))
    np.testing.assert_allclose(np.asarray(loss2), np.asarray(ref2), rtol=1e-3, atol=1e-3)

    # Case 3: batch = 24, tile = 8 -> 3 blocks on a (2, 2) grid; the last grid
    # step is fully out of range (clamped block index + all-zero mask).
    c_i3 = mk(ks[4], 24)
    c_j3 = mk(ks[5], 24)
    loss3 = jax.block_until_ready(
        global_structure_clustering_loss(c_i3, c_j3, class_num, temperature,
                                         block_batch=8))
    ref3 = jax.block_until_ready(_reference_loss(c_i3, c_j3, class_num, temperature))
    np.testing.assert_allclose(np.asarray(loss3), np.asarray(ref3), rtol=1e-3, atol=1e-3)

    print("KERNEL_OK")
</pallas_src>

<mosaic_0001>
module attributes {stable_mosaic.version = 11 : i64} {
  func.func @_gsc_partial_kernel(%arg0: i32, %arg1: i32, %arg2: memref<8x16xf32, #tpu.memory_space<vmem>>, %arg3: memref<8x16xf32, #tpu.memory_space<vmem>>, %arg4: memref<1x16x16xf32, #tpu.memory_space<vmem>>, %arg5: memref<1x16x16xf32, #tpu.memory_space<vmem>>, %arg6: memref<1x16x16xf32, #tpu.memory_space<vmem>>, %arg7: memref<1x1x16xf32, #tpu.memory_space<vmem>>, %arg8: memref<1x1x16xf32, #tpu.memory_space<vmem>>) attributes {dimension_semantics = [#tpu.dimension_semantics<parallel>, #tpu.dimension_semantics<arbitrary>], iteration_bounds = array<i64: 1, 1>, scalar_prefetch = 0 : i64, scratch_operands = 0 : i64, tpu.core_type = #tpu.core_type<tc>, window_params = [{pipeline_mode = #tpu.pipeline_mode<double_buffered>, transform_indices = @transform_0, window_bounds = array<i64: 8, 16>}, {pipeline_mode = #tpu.pipeline_mode<double_buffered>, transform_indices = @transform_1, window_bounds = array<i64: 8, 16>}, {transform_indices = @transform_2, window_bounds = array<i64: 1, 16, 16>}, {transform_indices = @transform_3, window_bounds = array<i64: 1, 16, 16>}, {transform_indices = @transform_4, window_bounds = array<i64: 1, 16, 16>}, {transform_indices = @transform_5, window_bounds = array<i64: 1, 1, 16>}, {transform_indices = @transform_6, window_bounds = array<i64: 1, 1, 16>}]} {
    %c0_i32 = arith.constant 0 : i32
    %0 = arith.cmpi eq, %arg1, %c0_i32 : i32
    %1 = arith.extui %0 : i1 to i32
    %c0_i32_0 = arith.constant 0 : i32
    %2 = arith.cmpi ne, %1, %c0_i32_0 : i32
    scf.if %2 {
      %cst_39 = arith.constant 0.000000e+00 : f32
      %41 = vector.broadcast %cst_39 : f32 to vector<16x16xf32>
      %c0_40 = arith.constant 0 : index
      %c0_41 = arith.constant 0 : index
      %c0_42 = arith.constant 0 : index
      %42 = vector.load %arg4[%c0_40, %c0_41, %c0_42] : memref<1x16x16xf32, #tpu.memory_space<vmem>>, vector<1x16x16xf32>
      %43 = vector.shape_cast %42 : vector<1x16x16xf32> to vector<16x16xf32>
      %44 = vector.shape_cast %41 : vector<16x16xf32> to vector<1x16x16xf32>
      tpu.vector_store %arg4[%c0_40, %c0_41, %c0_42], %44 {strides = array<i32>} : memref<1x16x16xf32, #tpu.memory_space<vmem>>, vector<1x16x16xf32>,
      %cst_43 = arith.constant 0.000000e+00 : f32
      %45 = vector.broadcast %cst_43 : f32 to vector<16x16xf32>
      %c0_44 = arith.constant 0 : index
      %c0_45 = arith.constant 0 : index
      %c0_46 = arith.constant 0 : index
      %46 = vector.load %arg5[%c0_44, %c0_45, %c0_46] : memref<1x16x16xf32, #tpu.memory_space<vmem>>, vector<1x16x16xf32>
      %47 = vector.shape_cast %46 : vector<1x16x16xf32> to vector<16x16xf32>
      %48 = vector.shape_cast %45 : vector<16x16xf32> to vector<1x16x16xf32>
      tpu.vector_store %arg5[%c0_44, %c0_45, %c0_46], %48 {strides = array<i32>} : memref<1x16x16xf32, #tpu.memory_space<vmem>>, vector<1x16x16xf32>,
      %cst_47 = arith.constant 0.000000e+00 : f32
      %49 = vector.broadcast %cst_47 : f32 to vector<16x16xf32>
      %c0_48 = arith.constant 0 : index
      %c0_49 = arith.constant 0 : index
      %c0_50 = arith.constant 0 : index
      %50 = vector.load %arg6[%c0_48, %c0_49, %c0_50] : memref<1x16x16xf32, #tpu.memory_space<vmem>>, vector<1x16x16xf32>
      %51 = vector.shape_cast %50 : vector<1x16x16xf32> to vector<16x16xf32>
      %52 = vector.shape_cast %49 : vector<16x16xf32> to vector<1x16x16xf32>
      tpu.vector_store %arg6[%c0_48, %c0_49, %c0_50], %52 {strides = array<i32>} : memref<1x16x16xf32, #tpu.memory_space<vmem>>, vector<1x16x16xf32>,
      %cst_51 = arith.constant 0.000000e+00 : f32
      %53 = vector.broadcast %cst_51 : f32 to vector<1x16xf32>
      %c0_52 = arith.constant 0 : index
      %c0_53 = arith.constant 0 : index
      %c0_54 = arith.constant 0 : index
      %54 = vector.load %arg7[%c0_52, %c0_53, %c0_54] : memref<1x1x16xf32, #tpu.memory_space<vmem>>, vector<1x1x16xf32>
      %55 = vector.shape_cast %54 : vector<1x1x16xf32> to vector<1x16xf32>
      %56 = vector.shape_cast %53 : vector<1x16xf32> to vector<1x1x16xf32>
      tpu.vector_store %arg7[%c0_52, %c0_53, %c0_54], %56 {strides = array<i32>} : memref<1x1x16xf32, #tpu.memory_space<vmem>>, vector<1x1x16xf32>,
      %cst_55 = arith.constant 0.000000e+00 : f32
      %57 = vector.broadcast %cst_55 : f32 to vector<1x16xf32>
      %c0_56 = arith.constant 0 : index
      %c0_57 = arith.constant 0 : index
      %c0_58 = arith.constant 0 : index
      %58 = vector.load %arg8[%c0_56, %c0_57, %c0_58] : memref<1x1x16xf32, #tpu.memory_space<vmem>>, vector<1x1x16xf32>
      %59 = vector.shape_cast %58 : vector<1x1x16xf32> to vector<1x16xf32>
      %60 = vector.shape_cast %57 : vector<1x16xf32> to vector<1x1x16xf32>
      tpu.vector_store %arg8[%c0_56, %c0_57, %c0_58], %60 {strides = array<i32>} : memref<1x1x16xf32, #tpu.memory_space<vmem>>, vector<1x1x16xf32>,
    } else {
    }
    %c0 = arith.constant 0 : index
    %c0_1 = arith.constant 0 : index
    %3 = vector.load %arg2[%c0, %c0_1] : memref<8x16xf32, #tpu.memory_space<vmem>>, vector<8x16xf32>
    %c0_2 = arith.constant 0 : index
    %c0_3 = arith.constant 0 : index
    %4 = vector.load %arg3[%c0_2, %c0_3] : memref<8x16xf32, #tpu.memory_space<vmem>>, vector<8x16xf32>
    %cst = arith.constant 1.000000e+00 : f32
    %5 = vector.broadcast %cst : f32 to vector<8x1xf32>
    %c0_4 = arith.constant 0 : index
    %c0_5 = arith.constant 0 : index
    %c0_6 = arith.constant 0 : index
    %6 = vector.load %arg4[%c0_4, %c0_5, %c0_6] : memref<1x16x16xf32, #tpu.memory_space<vmem>>, vector<1x16x16xf32>
    %7 = vector.shape_cast %6 : vector<1x16x16xf32> to vector<16x16xf32>
    %cst_7 = arith.constant dense<0.000000e+00> : vector<16x16xf32>
    %8 = tpu.matmul %3, %3, %cst_7 {dimension_numbers = #tpu.dot_dimension_numbers<[0], [0], [1], [1], [0, 1, 1, 1], [], []>} : vector<8x16xf32>, vector<8x16xf32>, vector<16x16xf32> -> vector<16x16xf32>
    %9 = arith.addf %7, %8 : vector<16x16xf32>
    %c0_8 = arith.constant 0 : index
    %c0_9 = arith.constant 0 : index
    %c0_10 = arith.constant 0 : index
    %10 = vector.load %arg4[%c0_8, %c0_9, %c0_10] : memref<1x16x16xf32, #tpu.memory_space<vmem>>, vector<1x16x16xf32>
    %11 = vector.shape_cast %10 : vector<1x16x16xf32> to vector<16x16xf32>
    %12 = vector.shape_cast %9 : vector<16x16xf32> to vector<1x16x16xf32>
    tpu.vector_store %arg4[%c0_8, %c0_9, %c0_10], %12 {strides = array<i32>} : memref<1x16x16xf32, #tpu.memory_space<vmem>>, vector<1x16x16xf32>,
    %c0_11 = arith.constant 0 : index
    %c0_12 = arith.constant 0 : index
    %c0_13 = arith.constant 0 : index
    %13 = vector.load %arg5[%c0_11, %c0_12, %c0_13] : memref<1x16x16xf32, #tpu.memory_space<vmem>>, vector<1x16x16xf32>
    %14 = vector.shape_cast %13 : vector<1x16x16xf32> to vector<16x16xf32>
    %cst_14 = arith.constant dense<0.000000e+00> : vector<16x16xf32>
    %15 = tpu.matmul %3, %4, %cst_14 {dimension_numbers = #tpu.dot_dimension_numbers<[0], [0], [1], [1], [0, 1, 1, 1], [], []>} : vector<8x16xf32>, vector<8x16xf32>, vector<16x16xf32> -> vector<16x16xf32>
    %16 = arith.addf %14, %15 : vector<16x16xf32>
    %c0_15 = arith.constant 0 : index
    %c0_16 = arith.constant 0 : index
    %c0_17 = arith.constant 0 : index
    %17 = vector.load %arg5[%c0_15, %c0_16, %c0_17] : memref<1x16x16xf32, #tpu.memory_space<vmem>>, vector<1x16x16xf32>
    %18 = vector.shape_cast %17 : vector<1x16x16xf32> to vector<16x16xf32>
    %19 = vector.shape_cast %16 : vector<16x16xf32> to vector<1x16x16xf32>
    tpu.vector_store %arg5[%c0_15, %c0_16, %c0_17], %19 {strides = array<i32>} : memref<1x16x16xf32, #tpu.memory_space<vmem>>, vector<1x16x16xf32>,
    %c0_18 = arith.constant 0 : index
    %c0_19 = arith.constant 0 : index
    %c0_20 = arith.constant 0 : index
    %20 = vector.load %arg6[%c0_18, %c0_19, %c0_20] : memref<1x16x16xf32, #tpu.memory_space<vmem>>, vector<1x16x16xf32>
    %21 = vector.shape_cast %20 : vector<1x16x16xf32> to vector<16x16xf32>
    %cst_21 = arith.constant dense<0.000000e+00> : vector<16x16xf32>
    %22 = tpu.matmul %4, %4, %cst_21 {dimension_numbers = #tpu.dot_dimension_numbers<[0], [0], [1], [1], [0, 1, 1, 1], [], []>} : vector<8x16xf32>, vector<8x16xf32>, vector<16x16xf32> -> vector<16x16xf32>
    %23 = arith.addf %21, %22 : vector<16x16xf32>
    %c0_22 = arith.constant 0 : index
    %c0_23 = arith.constant 0 : index
    %c0_24 = arith.constant 0 : index
    %24 = vector.load %arg6[%c0_22, %c0_23, %c0_24] : memref<1x16x16xf32, #tpu.memory_space<vmem>>, vector<1x16x16xf32>
    %25 = vector.shape_cast %24 : vector<1x16x16xf32> to vector<16x16xf32>
    %26 = vector.shape_cast %23 : vector<16x16xf32> to vector<1x16x16xf32>
    tpu.vector_store %arg6[%c0_22, %c0_23, %c0_24], %26 {strides = array<i32>} : memref<1x16x16xf32, #tpu.memory_space<vmem>>, vector<1x16x16xf32>,
    %c0_25 = arith.constant 0 : index
    %c0_26 = arith.constant 0 : index
    %c0_27 = arith.constant 0 : index
    %27 = vector.load %arg7[%c0_25, %c0_26, %c0_27] : memref<1x1x16xf32, #tpu.memory_space<vmem>>, vector<1x1x16xf32>
    %28 = vector.shape_cast %27 : vector<1x1x16xf32> to vector<1x16xf32>
    %cst_28 = arith.constant dense<0.000000e+00> : vector<1x16xf32>
    %29 = tpu.matmul %5, %3, %cst_28 {dimension_numbers = #tpu.dot_dimension_numbers<[0], [0], [1], [1], [0, 1, 1, 1], [], []>} : vector<8x1xf32>, vector<8x16xf32>, vector<1x16xf32> -> vector<1x16xf32>
    %30 = arith.addf %28, %29 : vector<1x16xf32>
    %c0_29 = arith.constant 0 : index
    %c0_30 = arith.constant 0 : index
    %c0_31 = arith.constant 0 : index
    %31 = vector.load %arg7[%c0_29, %c0_30, %c0_31] : memref<1x1x16xf32, #tpu.memory_space<vmem>>, vector<1x1x16xf32>
    %32 = vector.shape_cast %31 : vector<1x1x16xf32> to vector<1x16xf32>
    %33 = vector.shape_cast %30 : vector<1x16xf32> to vector<1x1x16xf32>
    tpu.vector_store %arg7[%c0_29, %c0_30, %c0_31], %33 {strides = array<i32>} : memref<1x1x16xf32, #tpu.memory_space<vmem>>, vector<1x1x16xf32>,
    %c0_32 = arith.constant 0 : index
    %c0_33 = arith.constant 0 : index
    %c0_34 = arith.constant 0 : index
    %34 = vector.load %arg8[%c0_32, %c0_33, %c0_34] : memref<1x1x16xf32, #tpu.memory_space<vmem>>, vector<1x1x16xf32>
    %35 = vector.shape_cast %34 : vector<1x1x16xf32> to vector<1x16xf32>
    %cst_35 = arith.constant dense<0.000000e+00> : vector<1x16xf32>
    %36 = tpu.matmul %5, %4, %cst_35 {dimension_numbers = #tpu.dot_dimension_numbers<[0], [0], [1], [1], [0, 1, 1, 1], [], []>} : vector<8x1xf32>, vector<8x16xf32>, vector<1x16xf32> -> vector<1x16xf32>
    %37 = arith.addf %35, %36 : vector<1x16xf32>
    %c0_36 = arith.constant 0 : index
    %c0_37 = arith.constant 0 : index
    %c0_38 = arith.constant 0 : index
    %38 = vector.load %arg8[%c0_36, %c0_37, %c0_38] : memref<1x1x16xf32, #tpu.memory_space<vmem>>, vector<1x1x16xf32>
    %39 = vector.shape_cast %38 : vector<1x1x16xf32> to vector<1x16xf32>
    %40 = vector.shape_cast %37 : vector<1x16xf32> to vector<1x1x16xf32>
    tpu.vector_store %arg8[%c0_36, %c0_37, %c0_38], %40 {strides = array<i32>} : memref<1x1x16xf32, #tpu.memory_space<vmem>>, vector<1x1x16xf32>,
    return
  }
  func.func @transform_0(%arg0: i32, %arg1: i32) -> (i32, i32) {
    %c1_i32 = arith.constant 1 : i32
    %0 = arith.muli %arg0, %c1_i32 : i32
    %1 = arith.addi %0, %arg1 : i32
    %c0_i32 = arith.constant 0 : i32
    %2 = arith.minsi %1, %c0_i32 : i32
    %c0_i32_0 = arith.constant 0 : i32
    %c0_i32_1 = arith.constant 0 : i32
    return %2, %c0_i32_0 : i32, i32
  }
  func.func @transform_1(%arg0: i32, %arg1: i32) -> (i32, i32) {
    %c1_i32 = arith.constant 1 : i32
    %0 = arith.muli %arg0, %c1_i32 : i32
    %1 = arith.addi %0, %arg1 : i32
    %c0_i32 = arith.constant 0 : i32
    %2 = arith.minsi %1, %c0_i32 : i32
    %c0_i32_0 = arith.constant 0 : i32
    %c0_i32_1 = arith.constant 0 : i32
    return %2, %c0_i32_0 : i32, i32
  }
  func.func @transform_2(%arg0: i32, %arg1: i32) -> (i32, i32, i32) {
    %c0_i32 = arith.constant 0 : i32
    %c0_i32_0 = arith.constant 0 : i32
    %c0_i32_1 = arith.constant 0 : i32
    return %arg0, %c0_i32, %c0_i32_0 : i32, i32, i32
  }
  func.func @transform_3(%arg0: i32, %arg1: i32) -> (i32, i32, i32) {
    %c0_i32 = arith.constant 0 : i32
    %c0_i32_0 = arith.constant 0 : i32
    %c0_i32_1 = arith.constant 0 : i32
    return %arg0, %c0_i32, %c0_i32_0 : i32, i32, i32
  }
  func.func @transform_4(%arg0: i32, %arg1: i32) -> (i32, i32, i32) {
    %c0_i32 = arith.constant 0 : i32
    %c0_i32_0 = arith.constant 0 : i32
    %c0_i32_1 = arith.constant 0 : i32
    return %arg0, %c0_i32, %c0_i32_0 : i32, i32, i32
  }
  func.func @transform_5(%arg0: i32, %arg1: i32) -> (i32, i32, i32) {
    %c0_i32 = arith.constant 0 : i32
    %c0_i32_0 = arith.constant 0 : i32
    %c0_i32_1 = arith.constant 0 : i32
    return %arg0, %c0_i32, %c0_i32_0 : i32, i32, i32
  }
  func.func @transform_6(%arg0: i32, %arg1: i32) -> (i32, i32, i32) {
    %c0_i32 = arith.constant 0 : i32
    %c0_i32_0 = arith.constant 0 : i32
    %c0_i32_1 = arith.constant 0 : i32
    return %arg0, %c0_i32, %c0_i32_0 : i32, i32, i32
  }
}

</mosaic_0001>

<bundles_post_ra>
// kernel: tpu_custom_call.1
= control target key start
LH: loop header
LB: loop body
LE: loop exit
PB: predicated region body
PF: predicated region fallthrough
CT: control target
= control target key end

     0   :  { %12 = vsyncpa [#allocation3], 0  ;;  %s1067_s0 = inlined_call_operand.hbm [shape: f32[8,16], index: 0, kind: input, shape index: {}]   ;;  %s1068_s1 = inlined_call_operand.hbm [shape: f32[8,16], index: 1, kind: input, shape index: {}]   ;;  %s1069_s2 = inlined_call_operand.hbm [shape: f32[1,16,16], index: 2, kind: output, shape index: {0}]   ;;  %s1070_s3 = inlined_call_operand.hbm [shape: f32[1,16,16], index: 3, kind: output, shape index: {1}]   ;;  %s1071_s4 = inlined_call_operand.hbm [shape: f32[1,16,16], index: 4, kind: output, shape index: {2}]   ;;  %s1072_s5 = inlined_call_operand.hbm [shape: f32[1,1,16], index: 5, kind: output, shape index: {3}]   ;;  %s1073_s6 = inlined_call_operand.hbm [shape: f32[1,1,16], index: 6, kind: output, shape index: {4}]  }
   0x1   :  { %13 = vsyncpa [#allocation6], 0 }
   0x2   :  { %14 = vsyncpa [#allocation4], 0 }
   0x3   :  { %15 = vsyncpa [#allocation9], 0 }
   0x4   :  { %16 = vsyncpa [#allocation12], 0  ;;  %s880_s21 = smov [#allocation2]   ;;  %s881_s23 = smov [#allocation5]  }
   0x5   :  { %s28_s22 = sshll.u32 %s880_s21, 4  ;;  %s43_s24 = sshll.u32 %s881_s23, 4  ;;  %s29_s22 = int_to_ptr.vmem [resolvable:$true] %s28_s22  ;;  %s44_s24 = int_to_ptr.vmem [resolvable:$true] %s43_s24 }
   0x6   :  { %s716_s27 = scalar_lea.hbm %s1067_s0, 128 }
   0x7   :  { %p717_p0 = scmp.ne.s32.totalorder %s1067_s0, %s716_s27  ;;  %p720_p1 = scmp.lt.u32.totalorder %s716_s27, %s1067_s0 }
   0x9   :  { %p722_p2 = pnand %p720_p1, %p717_p0 }
   0xb   :  { %725 = shalt.err (!%p722_p2)
}
   0xc   :  { %s726_s8 = scalar_lea.vmem %s29_s22, 128  ;;  %p731_p4 = scmp.lt.s32.totalorder %s29_s22, %s29_s22 }
   0xd   :  { %p727_p3 = scmp.ne.s32.totalorder %s29_s22, %s726_s8  ;;  %p732_p5 = scmp.lt.s32.totalorder %s726_s8, %s726_s8 }
   0xf   :  { %p733_p6 = por %p732_p5, %p731_p4 }
  0x11   :  { %p734_p7 = pnand %p733_p6, %p727_p3 }
  0x13   :  { %737 = shalt.err (!%p734_p7)
}
  0x14   :  { %31 = dma.hbm_to_vmem [thread:$0]  %s1067_s0, 128, %s29_s22, [#allocation3]  }
  0x15   :  { %s738_s13 = scalar_lea.hbm %s1068_s1, 128 }
  0x16   :  { %p739_p8 = scmp.ne.s32.totalorder %s1068_s1, %s738_s13  ;;  %p742_p9 = scmp.lt.u32.totalorder %s738_s13, %s1068_s1 }
  0x18   :  { %p744_p10 = pnand %p742_p9, %p739_p8 }
  0x1a   :  { %747 = shalt.err (!%p744_p10)
}
  0x1b   :  { %s748_s18 = scalar_lea.vmem %s44_s24, 128  ;;  %p753_p12 = scmp.lt.s32.totalorder %s44_s24, %s44_s24 }
  0x1c   :  { %p749_p11 = scmp.ne.s32.totalorder %s44_s24, %s748_s18  ;;  %p754_p13 = scmp.lt.s32.totalorder %s748_s18, %s748_s18 }
  0x1e   :  { %p755_p0 = por %p754_p13, %p753_p12 }
  0x20   :  { %p756_p1 = pnand %p755_p0, %p749_p11 }
  0x22   :  { %759 = shalt.err (!%p756_p1)
}
  0x23   :  { %46 = dma.hbm_to_vmem [thread:$0]  %s1068_s1, 128, %s44_s24, [#allocation6]  }
  0x24   :  { %870 = dma.done.wait [#allocation3], 128  }
  0x25   :  { %871 = vsyncadd [#allocation3], 4294967168 }
  0x26   :  { %872 = dma.done.wait [#allocation6], 128  }
  0x27   :  { %873 = vsyncadd [#allocation6], 4294967168  ;;  %v882_v0 = vmov 1.0   ;;  %v73_v1 = vld [vmem:[#allocation2] sm:$0xff]  ;;  %v74_v2 = vld [vmem:[#allocation5] sm:$0xff]  ;;  %v883_v3 = vmov 0.0  }
  0x28   :  { %397 = vxpose.xlu1.b32.start.end [1/1] (short) (narrow) %v882_v0, 8  ;;  %77 = vxpose.xlu0.b32.start.end [1/1] (short) (narrow) %v73_v1, 16  ;;  %vm63_vm0 = vcmask 130048   ;;  %vm109_vm1 = vcmask 64512   ;;  %vm884_vm2 = vmmov 0   ;;  %vm70_vm3 = vcmask 122880  }
  0x29   :  { %679 = vmatprep.subr.mxu0 %v73_v1  ;;  %684 = vmatprep.subr.mxu1 %v74_v2  ;;  %65 = vst.msk [vmem:[#allocation7 + $0x8] sm:$0xff] %vm63_vm0, %v883_v3  ;;  %64 = vst.msk [vmem:[#allocation7] sm:$0xff] %vm63_vm0, %v883_v3  ;;  %s885_s1 = smov [#allocation8]   ;;  %s886_s21 = smov [#allocation11]  }
  0x2a   :  { %680 = vmatpush3.msra.mxu0 %v73_v1  ;;  %685 = vmatpush3.msra.mxu1 %v74_v2  ;;  %66 = vst.msk [vmem:[#allocation8] sm:$0xff] %vm63_vm0, %v883_v3  ;;  %67 = vst.msk [vmem:[#allocation8 + $0x8] sm:$0xff] %vm63_vm0, %v883_v3  ;;  %s595_s20 = sshll.u32 %s885_s1, 4  ;;  %s620_s22 = sshll.u32 %s886_s21, 4  ;;  %s596_s20 = int_to_ptr.vmem [resolvable:$true] %s595_s20  ;;  %s969_s22 = int_to_ptr.vmem [resolvable:$true] %s620_s22 }
  0x2b   :  { %689 = vmatprep.subr.mxu0 %v74_v2  ;;  %694 = vmatprep.subr.mxu1 %v883_v3  ;;  %68 = vst.msk [vmem:[#allocation10] sm:$0xff] %vm63_vm0, %v883_v3  ;;  %69 = vst.msk [vmem:[#allocation10 + $0x8] sm:$0xff] %vm63_vm0, %v883_v3  ;;  %s887_s23 = smov [#allocation7]   ;;  %s760_s25 = scalar_lea.vmem %s596_s20, 256 }
  0x2c   :  { %71 = vst.msk [vmem:[#allocation11] sm:$0x1] %vm70_vm3, %v883_v3  ;;  %72 = vst.msk [vmem:[#allocation13] sm:$0x1] %vm70_vm3, %v883_v3  ;;  %s583_s24 = sshll.u32 %s887_s23, 4  ;;  %p761_p2 = scmp.ne.s32.totalorder %s596_s20, %s760_s25  ;;  %s971_s24 = int_to_ptr.vmem [resolvable:$true] %s583_s24 }
  0x2d   :  { %279 = vxpose.xlu0.b32.start.end [1/1] (short) (narrow) %v74_v2, 16  ;;  %p765_p3 = scmp.lt.s32.totalorder %s596_s20, %s596_s20  ;;  %p766_p4 = scmp.lt.s32.totalorder %s760_s25, %s760_s25 }
  0x2f   :  { %p767_p5 = por %p766_p4, %p765_p3 }
  0x30   :  { %v76_v9 = vld [vmem:[#allocation7 + $0x8] sm:$0xff]  ;;  %v75_v11 = vld [vmem:[#allocation7] sm:$0xff] }
  0x31   :  { %v197_v10 = vld [vmem:[#allocation8 + $0x8] sm:$0xff]  ;;  %v196_v12 = vld [vmem:[#allocation8] sm:$0xff]  ;;  %p768_p6 = pnand %p767_p5, %p761_p2 }
  0x33   :  { %v396_v21 = vld [vmem:[#allocation11] sm:$0x1] }
  0xa8   :  { %v93_v4 = vpop.trf.xlu0  ;;  %v413_v6 = vpop.trf.xlu1 }
  0xa9   :  { %681 = vmatprep.mubr.msk.f32.mxu0 %vm109_vm1, %v93_v4  ;;  %686 = vmatprep.mubr.msk.f32.mxu1 %vm109_vm1, %v93_v4 }
  0xac   :  { %v94_v5 = vpop.trf.xlu0 }
  0xad   :  { %682 = vmatmul.mubr.msk.f32.vlgmr.msra.gmra.mrb[0].mxu0 %vm109_vm1, %v94_v5  ;;  %687 = vmatmul.mubr.msk.f32.vlgmr.msra.gmra.mrb[0].mxu1 %vm109_vm1, %v94_v5 }
  0xae   :  { %690 = vmatpush3.msra.mxu0 %v74_v2  ;;  %695 = vmatpush3.msra.mxu1 %v73_v1 }
  0xaf   :  { %699 = vmatprep.subr.mxu0 %v883_v3  ;;  %696 = vmatprep.mubr.msk.f32.mxu1 %vm884_vm2, %v883_v3 }
  0xb0   :  { %v295_v7 = vpop.trf.xlu0 }
  0xb1   :  { %691 = vmatprep.mubr.msk.f32.mxu0 %vm109_vm1, %v295_v7  ;;  %697 = vmatmul.mubr.msk.f32.vlgmr.msra.gmra.mrb[2].mxu1 %vm109_vm1, %v413_v6 }
  0xb4   :  { %v296_v8 = vpop.trf.xlu0 }
  0xb5   :  { %692 = vmatmul.mubr.msk.f32.vlgmr.msra.gmra.mrb[2].mxu0 %vm109_vm1, %v296_v8 }
  0xb6   :  { %700 = vmatpush3.msra.mxu0 %v74_v2  ;;  %701 = vmatprep.mubr.msk.f32.mxu0 %vm884_vm2, %v883_v3 }
  0xb9   :  { %702 = vmatmul.mubr.msk.f32.vlgmr.msra.gmra.mrb[4].mxu0 %vm109_vm1, %v413_v6 }
 0x180   :  { %v683_v13 = vpop.f32.mrb[0].mxu0  ;;  %v688_v14 = vpop.f32.mrb[0].mxu1 }
 0x181   :  { %v192_v15 = vadd.f32 %v683_v13, %v76_v9  ;;  %v274_v16 = vadd.f32 %v688_v14, %v197_v10  ;;  %v182_v17 = vpop.f32.mrb[1].mxu0  ;;  %v264_v18 = vpop.f32.mrb[1].mxu1 }
 0x182   :  { %v191_v19 = vadd.f32 %v182_v17, %v75_v11  ;;  %v273_v20 = vadd.f32 %v264_v18, %v196_v12 }
 0x183   :  { %195 = vst.msk [vmem:[#allocation7 + $0x8] sm:$0xff] %vm63_vm0, %v192_v15  ;;  %276 = vst.msk [vmem:[#allocation8 + $0x8] sm:$0xff] %vm63_vm0, %v274_v16 }
 0x184   :  { %194 = vst.msk [vmem:[#allocation7] sm:$0xff] %vm63_vm0, %v191_v19  ;;  %275 = vst.msk [vmem:[#allocation8] sm:$0xff] %vm63_vm0, %v273_v20  ;;  %v498_v22 = vpop.f32.mrb[2].mxu1 }
 0x185   :  { %v502_v23 = vadd.f32 %v498_v22, %v396_v21  ;;  %v698_v24 = vpop.f32.mrb[3].mxu1 }
 0x186   :  { %771 = shalt.err (!%p768_p6)
}
 0x187   :  { %s772_s28 = scalar_lea.hbm %s1070_s3, 256 }
 0x188   :  { %p773_p7 = scmp.ne.s32.totalorder %s1070_s3, %s772_s28  ;;  %p776_p8 = scmp.lt.u32.totalorder %s772_s28, %s1070_s3 }
 0x18a   :  { %p778_p9 = pnand %p776_p8, %p773_p7 }
 0x18c   :  { %781 = shalt.err (!%p778_p9)
}
 0x18d   :  { %s888_s9 = smov 128   ;;  %s889_s10 = smov 8   ;;  %v278_v25 = vld [vmem:[#allocation10 + $0x8] sm:$0xff] }
 0x18e   :  { %601 = dma.vmem_to_hbm [thread:$0]  %s596_s20, 256, %s1070_s3, [#allocation9], %s888_s9, %s888_s9, %s889_s10  }
 0x18f   :  { %s782_s13 = scalar_lea.vmem %s971_s24, 256  ;;  %p787_p11 = scmp.lt.s32.totalorder %s971_s24, %s971_s24 }
 0x190   :  { %p783_p10 = scmp.ne.s32.totalorder %s971_s24, %s782_s13  ;;  %p788_p12 = scmp.lt.s32.totalorder %s782_s13, %s782_s13 }
 0x192   :  { %p789_p13 = por %p788_p12, %p787_p11 }
 0x194   :  { %p790_p0 = pnand %p789_p13, %p783_p10 }
 0x196   :  { %793 = shalt.err (!%p790_p0)
}
 0x197   :  { %s794_s16 = scalar_lea.hbm %s1069_s2, 256 }
 0x198   :  { %p795_p1 = scmp.ne.s32.totalorder %s1069_s2, %s794_s16  ;;  %p798_p2 = scmp.lt.u32.totalorder %s794_s16, %s1069_s2 }
 0x19a   :  { %p800_p3 = pnand %p798_p2, %p795_p1 }
 0x19c   :  { %803 = shalt.err (!%p800_p3)
}
 0x19d   :  { %589 = dma.vmem_to_hbm [thread:$0]  %s971_s24, 256, %s1069_s2, [#allocation4], %s888_s9, %s888_s9, %s889_s10   ;;  %v277_v26 = vld [vmem:[#allocation10] sm:$0xff]  ;;  %504 = vst.msk [vmem:[#allocation11] sm:$0x1] %vm70_vm3, %v502_v23  ;;  %v693_v27 = vpop.f32.mrb[2].mxu0 }
 0x19e   :  { %s890_s20 = smov [#allocation10]   ;;  %s804_s23 = scalar_lea.vmem %s969_s22, 16 }
 0x19f   :  { %s607_s21 = sshll.u32 %s890_s20, 4  ;;  %p805_p4 = scmp.ne.s32.totalorder %s969_s22, %s804_s23  ;;  %s608_s21 = int_to_ptr.vmem [resolvable:$true] %s607_s21 }
 0x1a0   :  { %s808_s25 = scalar_lea.vmem %s969_s22, 32  ;;  %p809_p5 = scmp.lt.s32.totalorder %s969_s22, %s969_s22 }
 0x1a1   :  { %p810_p6 = scmp.lt.s32.totalorder %s808_s25, %s804_s23 }
 0x1a3   :  { %p811_p7 = por %p810_p6, %p809_p5 }
 0x1a5   :  { %p812_p8 = pnand %p811_p7, %p805_p4 }
 0x1a7   :  { %815 = shalt.err (!%p812_p8)
}
 0x1a8   :  { %s816_s28 = scalar_lea.hbm %s1072_s5, 16 }
 0x1a9   :  { %p817_p9 = scmp.ne.s32.totalorder %s1072_s5, %s816_s28  ;;  %p820_p10 = scmp.lt.u32.totalorder %s816_s28, %s1072_s5 }
 0x1ab   :  { %p822_p11 = pnand %p820_p10, %p817_p9 }
 0x1ad   :  { %825 = shalt.err (!%p822_p11)
}
 0x1ae   :  { %623 = dma.vmem_to_hbm [thread:$0]  %s969_s22, 16, %s1072_s5, [#allocation12]   ;;  %v393_v28 = vadd.f32 %v693_v27, %v278_v25  ;;  %v383_v29 = vpop.f32.mrb[3].mxu0  ;;  %v505_v31 = vld [vmem:[#allocation13] sm:$0x1] }
 0x1af   :  { %s891_s11 = smov [#allocation13]   ;;  %v392_v30 = vadd.f32 %v383_v29, %v277_v26  ;;  %v572_v32 = vpop.f32.mrb[4].mxu0  ;;  %s826_s13 = scalar_lea.vmem %s608_s21, 256 }
 0x1b0   :  { %s630_s12 = sshll.u32 %s891_s11, 4  ;;  %395 = vst.msk [vmem:[#allocation10 + $0x8] sm:$0xff] %vm63_vm0, %v393_v28  ;;  %v576_v33 = vadd.f32 %v572_v32, %v505_v31  ;;  %v703_v34 = vpop.f32.mrb[5].mxu0  ;;  %p827_p12 = scmp.ne.s32.totalorder %s608_s21, %s826_s13  ;;  %s1031_s12 = int_to_ptr.vmem [resolvable:$true] %s630_s12 }
 0x1b1   :  { %394 = vst.msk [vmem:[#allocation10] sm:$0xff] %vm63_vm0, %v392_v30  ;;  %p831_p13 = scmp.lt.s32.totalorder %s608_s21, %s608_s21  ;;  %p832_p0 = scmp.lt.s32.totalorder %s826_s13, %s826_s13 }
 0x1b3   :  { %p833_p1 = por %p832_p0, %p831_p13 }
 0x1b5   :  { %p834_p2 = pnand %p833_p1, %p827_p12 }
 0x1b7   :  { %837 = shalt.err (!%p834_p2)
}
 0x1b8   :  { %s838_s14 = scalar_lea.hbm %s1071_s4, 256 }
 0x1b9   :  { %p839_p3 = scmp.ne.s32.totalorder %s1071_s4, %s838_s14  ;;  %p842_p4 = scmp.lt.u32.totalorder %s838_s14, %s1071_s4 }
 0x1bb   :  { %p844_p5 = pnand %p842_p4, %p839_p3 }
 0x1bd   :  { %847 = shalt.err (!%p844_p5)
}
 0x1be   :  { %613 = dma.vmem_to_hbm [thread:$0]  %s608_s21, 256, %s1071_s4, [#allocation9], %s888_s9, %s888_s9, %s889_s10   ;;  %577 = vst.msk [vmem:[#allocation13] sm:$0x1] %vm70_vm3, %v576_v33 }
 0x1bf   :  { %s848_s3 = scalar_lea.vmem %s1031_s12, 16  ;;  %s852_s1 = scalar_lea.vmem %s1031_s12, 32 }
 0x1c0   :  { %p849_p6 = scmp.ne.s32.totalorder %s1031_s12, %s848_s3  ;;  %p853_p7 = scmp.lt.s32.totalorder %s1031_s12, %s1031_s12 }
 0x1c1   :  { %p854_p8 = scmp.lt.s32.totalorder %s852_s1, %s848_s3 }
 0x1c3   :  { %p855_p9 = por %p854_p8, %p853_p7 }
 0x1c5   :  { %p856_p10 = pnand %p855_p9, %p849_p6 }
 0x1c7   :  { %859 = shalt.err (!%p856_p10)
}
 0x1c8   :  { %s860_s25 = scalar_lea.hbm %s1073_s6, 16 }
 0x1c9   :  { %p861_p11 = scmp.ne.s32.totalorder %s1073_s6, %s860_s25  ;;  %p864_p12 = scmp.lt.u32.totalorder %s860_s25, %s1073_s6 }
 0x1cb   :  { %p866_p13 = pnand %p864_p12, %p861_p11 }
 0x1cd   :  { %869 = shalt.err (!%p866_p13)
}
 0x1ce   :  { %633 = dma.vmem_to_hbm [thread:$0]  %s1031_s12, 16, %s1073_s6, [#allocation12]  }
 0x1cf   :  { %874 = dma.done.wait [#allocation4], 256  }
 0x1d0   :  { %875 = vsyncadd [#allocation4], 4294967040 }
 0x1d1   :  { %876 = dma.done.wait [#allocation9], 512  }
 0x1d2   :  { %877 = vsyncadd [#allocation9], 4294966784 }
 0x1d3   :  { %878 = dma.done.wait [#allocation12], 32  }
 0x1d4   :  { %879 = vsyncadd [#allocation12], 4294967264 }
 0x1d5   :  { %649 = vsyncpa [#allocation3], 1 }
 0x1d6   :  { %650 = vsyncpa [#allocation6], 1 }
 0x1d7   :  { %651 = vsyncpa [#allocation4], 1 }
 0x1d8   :  { %652 = vsyncpa [#allocation9], 1 }
 0x1d9   :  { %653 = vsyncpa [#allocation12], 1 }

</bundles_post_ra>
